<compile_context>
chip_gen: v7x
topology: tpu7x:2x2x1
jax: 0.10.0
libtpu: 0.0.40
codegen_flags: <defaults>
</compile_context>

<pallas_src>
import jax
import jax.numpy as jnp
from jax.experimental import pallas as pl
from jax.experimental.pallas import tpu as pltpu


def _rup(v, m):
    return ((v + m - 1) // m) * m


def _vmem_limit_bytes():
    # Per-generation VMEM budget: ~100 MiB on 128 MiB parts (v5e/v6e), ~40 MiB on 64 MiB (v7x).
    try:
        cap = int(pltpu.get_tpu_info().vmem_capacity_bytes)
    except Exception:
        cap = 64 * 1024 * 1024
    return (100 if cap >= 128 * 1024 * 1024 else 40) * 1024 * 1024


# ------------------------------ kernel A: edge messages ------------------------------ #

def _edge_message_kernel(xs_ref, ea_ref, wmx_ref, wme_ref, bm_ref, m_ref):
    # m = ReLU(x_src @ Wmx + edge_attr @ Wme + bm), stored bf16
    m = jnp.dot(xs_ref[...], wmx_ref[...], preferred_element_type=jnp.float32)
    m = m + jnp.dot(ea_ref[...], wme_ref[...], preferred_element_type=jnp.float32)
    m = m + bm_ref[...]
    m_ref[...] = jnp.maximum(m, 0.0).astype(m_ref.dtype)


# ------------------------- kernel B: scatter-add + node update ----------------------- #

def _scatter_update_kernel(dst_ref, m_ref, x_ref, wux_ref, wua_ref, bu_ref,
                           out_ref, acc_ref):
    i = pl.program_id(0)                      # node tile (parallel)
    j = pl.program_id(1)                      # edge tile (reduction, innermost)
    TN = out_ref.shape[0]
    TE = m_ref.shape[0]

    @pl.when(j == 0)
    def _init():
        acc_ref[...] = jnp.zeros_like(acc_ref)

    # scatter-add: one-hot built pre-transposed [TN, TE]; offset applied to the [1, TE] dst row
    dst_local = dst_ref[...] - i * TN                                   # [1, TE] int32
    onehot_t = (jax.lax.broadcasted_iota(jnp.int32, (TN, TE), 0) == dst_local
                ).astype(jnp.bfloat16)                                  # [TN, TE]
    acc_ref[...] += jnp.dot(onehot_t, m_ref[...],
                            preferred_element_type=jnp.float32)         # [TN, h_p] f32

    @pl.when(j == pl.num_programs(1) - 1)
    def _finalize():
        h = jnp.dot(x_ref[...], wux_ref[...], preferred_element_type=jnp.float32)
        h = h + jnp.dot(acc_ref[...].astype(jnp.bfloat16), wua_ref[...],
                        preferred_element_type=jnp.float32)
        h = h + bu_ref[...]
        out_ref[...] = jnp.maximum(h, 0.0).astype(out_ref.dtype)


# ------------------------------ wrapper ------------------------------ #

_DEF_TN = 256                       # node-tile rows
_DEF_TE = 512                       # edge-tile rows


def custom_graph_layer(x, edge_index, edge_attr, params,
                       out_dtype=jnp.bfloat16, tn_max=_DEF_TN, te_max=_DEF_TE):
    """One CustomGraphLayer forward as two tiled Pallas kernels (edge phase + node phase)."""
    N, cin = x.shape
    E, ce = edge_attr.shape
    h = params["wmx"].shape[1]

    cin_p, ce_p, h_p = _rup(cin, 128), _rup(ce, 128), _rup(h, 128)
    TN = min(tn_max, _rup(N, 16))
    TE = min(te_max, _rup(E, 16))
    N_pad, E_pad = _rup(N, TN), _rup(E, TE)
    n_tiles, e_tiles = N_pad // TN, E_pad // TE

    f32, bf16 = jnp.float32, jnp.bfloat16
    vmem_limit = _vmem_limit_bytes()

    # Lane-dense, zero-padded operands (padded weight rows/cols are zero).
    x_p = jnp.zeros((N_pad, cin_p), bf16).at[:N, :cin].set(x.astype(bf16))
    ea_p = jnp.zeros((E_pad, ce_p), bf16).at[:E, :ce].set(edge_attr.astype(bf16))
    # Padded edges: src clamped to 0 (finite junk message), dst = -1 (never matches -> dropped).
    src = jnp.zeros((E_pad,), jnp.int32).at[:E].set(edge_index[0].astype(jnp.int32))
    dst = jnp.full((1, E_pad), -1, jnp.int32).at[0, :E].set(edge_index[1].astype(jnp.int32))

    # Pre-gather source-node features in the wrapper (XLA HBM gather) -> edge-tiled kernel input.
    x_src = jnp.take(x_p, src, axis=0)                                   # [E_pad, cin_p] bf16

    wmx = jnp.zeros((cin_p, h_p), bf16).at[:cin, :h].set(params["wmx"].astype(bf16))
    wme = jnp.zeros((ce_p, h_p), bf16).at[:ce, :h].set(params["wme"].astype(bf16))
    bm = jnp.zeros((1, h_p), f32).at[:, :h].set(params["bm"])
    wux = jnp.zeros((cin_p, h_p), bf16).at[:cin, :h].set(params["wux"].astype(bf16))
    wua = jnp.zeros((h_p, h_p), bf16).at[:h, :h].set(params["wua"].astype(bf16))
    bu = jnp.zeros((1, h_p), f32).at[:, :h].set(params["bu"])

    # ---------------- kernel A: per-edge messages ---------------- #
    flops_a = 2 * E_pad * (cin_p + ce_p) * h_p
    bytes_a = int(2 * (x_src.size + ea_p.size + wmx.size + wme.size + E_pad * h_p)
                  + 4 * bm.size)
    msgs = pl.pallas_call(
        _edge_message_kernel,
        out_shape=jax.ShapeDtypeStruct((E_pad, h_p), bf16),
        grid_spec=pltpu.PrefetchScalarGridSpec(
            num_scalar_prefetch=0,
            grid=(e_tiles,),
            in_specs=[
                pl.BlockSpec((TE, cin_p), lambda j: (j, 0)),        # pre-gathered x_src tile
                pl.BlockSpec((TE, ce_p), lambda j: (j, 0)),         # edge_attr tile
                pl.BlockSpec((cin_p, h_p), lambda j: (0, 0)),       # message weight (x part)
                pl.BlockSpec((ce_p, h_p), lambda j: (0, 0)),        # message weight (edge part)
                pl.BlockSpec((1, h_p), lambda j: (0, 0)),           # message bias
            ],
            out_specs=pl.BlockSpec((TE, h_p), lambda j: (j, 0)),    # bf16 messages
        ),
        compiler_params=pltpu.CompilerParams(
            dimension_semantics=("parallel",),
            vmem_limit_bytes=vmem_limit),
        cost_estimate=pl.CostEstimate(flops=int(flops_a), transcendentals=0,
                                      bytes_accessed=bytes_a),
    )(x_src, ea_p, wmx, wme, bm)

    # ---------------- kernel B: scatter-add + node update ---------------- #
    out_bytes = N_pad * h_p * (2 if out_dtype == bf16 else 4)
    flops_b = 2 * N_pad * E_pad * h_p + 2 * N_pad * (cin_p + h_p) * h_p
    bytes_b = int(n_tiles * (2 * E_pad * h_p + 4 * E_pad)
                  + 2 * (N_pad * cin_p + wux.size + wua.size) + 4 * bu.size + out_bytes)
    out = pl.pallas_call(
        _scatter_update_kernel,
        out_shape=jax.ShapeDtypeStruct((N_pad, h_p), out_dtype),
        grid_spec=pltpu.PrefetchScalarGridSpec(
            num_scalar_prefetch=0,
            grid=(n_tiles, e_tiles),                                # edge (reduction) axis last
            in_specs=[
                pl.BlockSpec((1, TE), lambda i, j: (0, j)),         # dst tile (row)
                pl.BlockSpec((TE, h_p), lambda i, j: (j, 0)),       # message tile
                pl.BlockSpec((TN, cin_p), lambda i, j: (i, 0)),     # node-feature tile
                pl.BlockSpec((cin_p, h_p), lambda i, j: (0, 0)),    # update weight (x part)
                pl.BlockSpec((h_p, h_p), lambda i, j: (0, 0)),      # update weight (agg part)
                pl.BlockSpec((1, h_p), lambda i, j: (0, 0)),        # update bias
            ],
            out_specs=pl.BlockSpec((TN, h_p), lambda i, j: (i, 0)), # resident across edge axis
            scratch_shapes=[pltpu.VMEM((TN, h_p), jnp.float32)],
        ),
        compiler_params=pltpu.CompilerParams(
            dimension_semantics=("parallel", "arbitrary"),
            vmem_limit_bytes=vmem_limit),
        cost_estimate=pl.CostEstimate(flops=int(flops_b), transcendentals=0,
                                      bytes_accessed=bytes_b),
    )(dst, msgs, x_p, wux, wua, bu)

    return out[:N, :h]                         # strip node/channel padding


# ----------------------------- parameter setup ----------------------------- #

def _init_layer(key, cin, ce, cout):
    k1, k2, k3, k4, k5, k6 = jax.random.split(key, 6)
    lim_m = 1.0 / jnp.sqrt(jnp.float32(cin + ce))      # nn.Linear(cin+ce, cout)
    lim_u = 1.0 / jnp.sqrt(jnp.float32(cin + cout))    # nn.Linear(cin+cout, cout)
    u = lambda k, s, lim: jax.random.uniform(k, s, jnp.float32, -lim, lim)
    return dict(
        wmx=u(k1, (cin, cout), lim_m),   # message weight, x_src part
        wme=u(k2, (ce, cout), lim_m),    # message weight, edge_attr part
        bm=u(k3, (1, cout), lim_m),
        wux=u(k4, (cin, cout), lim_u),   # update weight, x part
        wua=u(k5, (cout, cout), lim_u),  # update weight, aggregated part
        bu=u(k6, (1, cout), lim_u),
    )


def init_gnn(key, node_in, edge_in, hidden, out_features, depth=0):
    """Replicates the channel bookkeeping of GNN.__init__."""
    keys = jax.random.split(key, 2 * depth + 2)
    ki = 0
    params = {"down": [], "up": []}
    in_ch, h = node_in, hidden
    for _ in range(depth):
        params["down"].append(_init_layer(keys[ki], in_ch, edge_in, h)); ki += 1
        in_ch = h
        h *= 2
    params["bottleneck"] = _init_layer(keys[ki], in_ch, edge_in, h); ki += 1
    h //= 2
    for _ in range(depth):
        params["up"].append(_init_layer(keys[ki], h * 2, edge_in, h)); ki += 1
        h //= 2
    params["final"] = _init_layer(keys[ki], h * 2, edge_in, out_features)
    return params


def gnn_forward(params, x, edge_index, edge_attr):
    skips = []
    for p in params["down"]:
        x = custom_graph_layer(x, edge_index, edge_attr, p)          # bf16 intermediates
        skips.append(x)
    x = custom_graph_layer(x, edge_index, edge_attr, params["bottleneck"])
    for p, skip in zip(params["up"], reversed(skips)):
        x = jnp.concatenate([x, skip], axis=1)      # same as torch.cat(dim=1)
        x = custom_graph_layer(x, edge_index, edge_attr, p)
    x = custom_graph_layer(x, edge_index, edge_attr, params["final"],
                           out_dtype=jnp.float32)                    # final layer in f32
    return x


if __name__ == "__main__":
    key = jax.random.PRNGKey(0)
    k_param, k_x, k_ea, k_src, k_dst = jax.random.split(key, 5)

    # small synthetic graph
    N, E = 16, 32
    NODE_IN, EDGE_IN, HIDDEN, OUT, DEPTH = 8, 4, 32, 8, 0

    x = jax.random.normal(k_x, (N, NODE_IN), jnp.float32)
    edge_attr = jax.random.normal(k_ea, (E, EDGE_IN), jnp.float32)
    edge_index = jnp.stack([
        jax.random.randint(k_src, (E,), 0, N, jnp.int32),
        jax.random.randint(k_dst, (E,), 0, N, jnp.int32),
    ], axis=0)                                      # [2, E] like PyG

    params = init_gnn(k_param, NODE_IN, EDGE_IN, HIDDEN, OUT, depth=DEPTH)

    fwd = jax.jit(gnn_forward)
    out = fwd(params, x, edge_index, edge_attr)
    out = jax.block_until_ready(out)

    assert out.shape == (N, OUT), out.shape
    assert bool(jnp.all(jnp.isfinite(out)))
    print("KERNEL_OK")
</pallas_src>

<mosaic_0001>
module attributes {stable_mosaic.version = 11 : i64} {
  func.func @_edge_message_kernel(%arg0: i32, %arg1: memref<32x128xbf16, #tpu.memory_space<vmem>>, %arg2: memref<32x128xbf16, #tpu.memory_space<vmem>>, %arg3: memref<128x128xbf16, #tpu.memory_space<vmem>>, %arg4: memref<128x128xbf16, #tpu.memory_space<vmem>>, %arg5: memref<1x128xf32, #tpu.memory_space<vmem>>, %arg6: memref<32x128xbf16, #tpu.memory_space<vmem>>) attributes {dimension_semantics = [#tpu.dimension_semantics<parallel>], iteration_bounds = array<i64: 1>, scalar_prefetch = 0 : i64, scratch_operands = 0 : i64, tpu.core_type = #tpu.core_type<tc>, window_params = [{transform_indices = @transform_0, window_bounds = array<i64: 32, 128>}, {transform_indices = @transform_1, window_bounds = array<i64: 32, 128>}, {pipeline_mode = #tpu.pipeline_mode<synchronous>, transform_indices = @transform_2, window_bounds = array<i64: 128, 128>}, {pipeline_mode = #tpu.pipeline_mode<synchronous>, transform_indices = @transform_3, window_bounds = array<i64: 128, 128>}, {pipeline_mode = #tpu.pipeline_mode<synchronous>, transform_indices = @transform_4, window_bounds = array<i64: 1, 128>}, {transform_indices = @transform_5, window_bounds = array<i64: 32, 128>}]} {
    %c0 = arith.constant 0 : index
    %c0_0 = arith.constant 0 : index
    %0 = vector.load %arg1[%c0, %c0_0] : memref<32x128xbf16, #tpu.memory_space<vmem>>, vector<32x128xbf16>
    %c0_1 = arith.constant 0 : index
    %c0_2 = arith.constant 0 : index
    %1 = vector.load %arg3[%c0_1, %c0_2] : memref<128x128xbf16, #tpu.memory_space<vmem>>, vector<128x128xbf16>
    %cst = arith.constant dense<0.000000e+00> : vector<32x128xf32>
    %2 = tpu.matmul %0, %1, %cst {dimension_numbers = #tpu.dot_dimension_numbers<[1], [0], [0], [1], [0, 0, 1, 1], [], []>} : vector<32x128xbf16>, vector<128x128xbf16>, vector<32x128xf32> -> vector<32x128xf32>
    %c0_3 = arith.constant 0 : index
    %c0_4 = arith.constant 0 : index
    %3 = vector.load %arg2[%c0_3, %c0_4] : memref<32x128xbf16, #tpu.memory_space<vmem>>, vector<32x128xbf16>
    %c0_5 = arith.constant 0 : index
    %c0_6 = arith.constant 0 : index
    %4 = vector.load %arg4[%c0_5, %c0_6] : memref<128x128xbf16, #tpu.memory_space<vmem>>, vector<128x128xbf16>
    %cst_7 = arith.constant dense<0.000000e+00> : vector<32x128xf32>
    %5 = tpu.matmul %3, %4, %cst_7 {dimension_numbers = #tpu.dot_dimension_numbers<[1], [0], [0], [1], [0, 0, 1, 1], [], []>} : vector<32x128xbf16>, vector<128x128xbf16>, vector<32x128xf32> -> vector<32x128xf32>
    %6 = arith.addf %2, %5 : vector<32x128xf32>
    %c0_8 = arith.constant 0 : index
    %c0_9 = arith.constant 0 : index
    %7 = vector.load %arg5[%c0_8, %c0_9] : memref<1x128xf32, #tpu.memory_space<vmem>>, vector<1x128xf32>
    %8 = vector.broadcast %7 : vector<1x128xf32> to vector<32x128xf32>
    %9 = arith.addf %6, %8 : vector<32x128xf32>
    %cst_10 = arith.constant 0.000000e+00 : f32
    %10 = vector.broadcast %cst_10 : f32 to vector<32x128xf32>
    %11 = arith.maximumf %9, %10 : vector<32x128xf32>
    %12 = arith.truncf %11 : vector<32x128xf32> to vector<32x128xbf16>
    %c0_11 = arith.constant 0 : index
    %c0_12 = arith.constant 0 : index
    %13 = vector.load %arg6[%c0_11, %c0_12] : memref<32x128xbf16, #tpu.memory_space<vmem>>, vector<32x128xbf16>
    tpu.vector_store %arg6[%c0_11, %c0_12], %12 {strides = array<i32>} : memref<32x128xbf16, #tpu.memory_space<vmem>>, vector<32x128xbf16>,
    return
  }
  func.func @transform_0(%arg0: i32) -> (i32, i32) {
    %c0_i32 = arith.constant 0 : i32
    %c0_i32_0 = arith.constant 0 : i32
    return %arg0, %c0_i32 : i32, i32
  }
  func.func @transform_1(%arg0: i32) -> (i32, i32) {
    %c0_i32 = arith.constant 0 : i32
    %c0_i32_0 = arith.constant 0 : i32
    return %arg0, %c0_i32 : i32, i32
  }
  func.func @transform_2(%arg0: i32) -> (i32, i32) {
    %c0_i32 = arith.constant 0 : i32
    %c0_i32_0 = arith.constant 0 : i32
    %c0_i32_1 = arith.constant 0 : i32
    return %c0_i32, %c0_i32_0 : i32, i32
  }
  func.func @transform_3(%arg0: i32) -> (i32, i32) {
    %c0_i32 = arith.constant 0 : i32
    %c0_i32_0 = arith.constant 0 : i32
    %c0_i32_1 = arith.constant 0 : i32
    return %c0_i32, %c0_i32_0 : i32, i32
  }
  func.func @transform_4(%arg0: i32) -> (i32, i32) {
    %c0_i32 = arith.constant 0 : i32
    %c0_i32_0 = arith.constant 0 : i32
    %c0_i32_1 = arith.constant 0 : i32
    return %c0_i32, %c0_i32_0 : i32, i32
  }
  func.func @transform_5(%arg0: i32) -> (i32, i32) {
    %c0_i32 = arith.constant 0 : i32
    %c0_i32_0 = arith.constant 0 : i32
    return %arg0, %c0_i32 : i32, i32
  }
}

module attributes {stable_mosaic.version = 11 : i64} {
  func.func @_scatter_update_kernel(%arg0: i32, %arg1: i32, %arg2: memref<1x32xi32, #tpu.memory_space<vmem>>, %arg3: memref<32x128xbf16, #tpu.memory_space<vmem>>, %arg4: memref<16x128xbf16, #tpu.memory_space<vmem>>, %arg5: memref<128x128xbf16, #tpu.memory_space<vmem>>, %arg6: memref<128x128xbf16, #tpu.memory_space<vmem>>, %arg7: memref<1x128xf32, #tpu.memory_space<vmem>>, %arg8: memref<16x128xbf16, #tpu.memory_space<vmem>>, %arg9: memref<16x128xf32, #tpu.memory_space<vmem>>) attributes {dimension_semantics = [#tpu.dimension_semantics<parallel>, #tpu.dimension_semantics<arbitrary>], iteration_bounds = array<i64: 1, 1>, scalar_prefetch = 0 : i64, scratch_operands = 1 : i64, tpu.core_type = #tpu.core_type<tc>, window_params = [{transform_indices = @transform_0, window_bounds = array<i64: 1, 32>}, {transform_indices = @transform_1, window_bounds = array<i64: 32, 128>}, {transform_indices = @transform_2, window_bounds = array<i64: 16, 128>}, {pipeline_mode = #tpu.pipeline_mode<synchronous>, transform_indices = @transform_3, window_bounds = array<i64: 128, 128>}, {pipeline_mode = #tpu.pipeline_mode<synchronous>, transform_indices = @transform_4, window_bounds = array<i64: 128, 128>}, {pipeline_mode = #tpu.pipeline_mode<synchronous>, transform_indices = @transform_5, window_bounds = array<i64: 1, 128>}, {transform_indices = @transform_6, window_bounds = array<i64: 16, 128>}]} {
    %c0_i32 = arith.constant 0 : i32
    %0 = arith.cmpi eq, %arg1, %c0_i32 : i32
    %1 = arith.extui %0 : i1 to i32
    %c0_i32_0 = arith.constant 0 : i32
    %2 = arith.cmpi ne, %1, %c0_i32_0 : i32
    scf.if %2 {
      %cst_10 = arith.constant 0.000000e+00 : f32
      %21 = vector.broadcast %cst_10 : f32 to vector<16x128xf32>
      %c0_11 = arith.constant 0 : index
      %c0_12 = arith.constant 0 : index
      %22 = vector.load %arg9[%c0_11, %c0_12] : memref<16x128xf32, #tpu.memory_space<vmem>>, vector<16x128xf32>
      tpu.vector_store %arg9[%c0_11, %c0_12], %21 {strides = array<i32>} : memref<16x128xf32, #tpu.memory_space<vmem>>, vector<16x128xf32>,
    } else {
    }
    %c0 = arith.constant 0 : index
    %c0_1 = arith.constant 0 : index
    %3 = vector.load %arg2[%c0, %c0_1] : memref<1x32xi32, #tpu.memory_space<vmem>>, vector<1x32xi32>
    %c16_i32 = arith.constant 16 : i32
    %4 = arith.muli %arg0, %c16_i32 : i32
    %5 = vector.broadcast %4 : i32 to vector<1x32xi32>
    %6 = arith.subi %3, %5 : vector<1x32xi32>
    %7 = tpu.iota {dimensions = array<i32: 0>} : vector<16x32xi32>
    %8 = vector.broadcast %6 : vector<1x32xi32> to vector<16x32xi32>
    %9 = arith.cmpi eq, %7, %8 : vector<16x32xi32>
    %10 = arith.extui %9 : vector<16x32xi1> to vector<16x32xi32>
    %11 = arith.sitofp %10 : vector<16x32xi32> to vector<16x32xf32>
    %12 = arith.truncf %11 : vector<16x32xf32> to vector<16x32xbf16>
    %c0_2 = arith.constant 0 : index
    %c0_3 = arith.constant 0 : index
    %13 = vector.load %arg9[%c0_2, %c0_3] : memref<16x128xf32, #tpu.memory_space<vmem>>, vector<16x128xf32>
    %c0_4 = arith.constant 0 : index
    %c0_5 = arith.constant 0 : index
    %14 = vector.load %arg3[%c0_4, %c0_5] : memref<32x128xbf16, #tpu.memory_space<vmem>>, vector<32x128xbf16>
    %cst = arith.constant dense<0.000000e+00> : vector<16x128xf32>
    %15 = tpu.matmul %12, %14, %cst {dimension_numbers = #tpu.dot_dimension_numbers<[1], [0], [0], [1], [0, 0, 1, 1], [], []>} : vector<16x32xbf16>, vector<32x128xbf16>, vector<16x128xf32> -> vector<16x128xf32>
    %16 = arith.addf %13, %15 : vector<16x128xf32>
    %c0_6 = arith.constant 0 : index
    %c0_7 = arith.constant 0 : index
    %17 = vector.load %arg9[%c0_6, %c0_7] : memref<16x128xf32, #tpu.memory_space<vmem>>, vector<16x128xf32>
    tpu.vector_store %arg9[%c0_6, %c0_7], %16 {strides = array<i32>} : memref<16x128xf32, #tpu.memory_space<vmem>>, vector<16x128xf32>,
    %c0_i32_8 = arith.constant 0 : i32
    %18 = arith.cmpi eq, %arg1, %c0_i32_8 : i32
    %19 = arith.extui %18 : i1 to i32
    %c0_i32_9 = arith.constant 0 : i32
    %20 = arith.cmpi ne, %19, %c0_i32_9 : i32
    scf.if %20 {
      %c0_10 = arith.constant 0 : index
      %c0_11 = arith.constant 0 : index
      %21 = vector.load %arg4[%c0_10, %c0_11] : memref<16x128xbf16, #tpu.memory_space<vmem>>, vector<16x128xbf16>
      %c0_12 = arith.constant 0 : index
      %c0_13 = arith.constant 0 : index
      %22 = vector.load %arg5[%c0_12, %c0_13] : memref<128x128xbf16, #tpu.memory_space<vmem>>, vector<128x128xbf16>
      %cst_14 = arith.constant dense<0.000000e+00> : vector<16x128xf32>
      %23 = tpu.matmul %21, %22, %cst_14 {dimension_numbers = #tpu.dot_dimension_numbers<[1], [0], [0], [1], [0, 0, 1, 1], [], []>} : vector<16x128xbf16>, vector<128x128xbf16>, vector<16x128xf32> -> vector<16x128xf32>
      %c0_15 = arith.constant 0 : index
      %c0_16 = arith.constant 0 : index
      %24 = vector.load %arg9[%c0_15, %c0_16] : memref<16x128xf32, #tpu.memory_space<vmem>>, vector<16x128xf32>
      %25 = arith.truncf %24 : vector<16x128xf32> to vector<16x128xbf16>
      %c0_17 = arith.constant 0 : index
      %c0_18 = arith.constant 0 : index
      %26 = vector.load %arg6[%c0_17, %c0_18] : memref<128x128xbf16, #tpu.memory_space<vmem>>, vector<128x128xbf16>
      %cst_19 = arith.constant dense<0.000000e+00> : vector<16x128xf32>
      %27 = tpu.matmul %25, %26, %cst_19 {dimension_numbers = #tpu.dot_dimension_numbers<[1], [0], [0], [1], [0, 0, 1, 1], [], []>} : vector<16x128xbf16>, vector<128x128xbf16>, vector<16x128xf32> -> vector<16x128xf32>
      %28 = arith.addf %23, %27 : vector<16x128xf32>
      %c0_20 = arith.constant 0 : index
      %c0_21 = arith.constant 0 : index
      %29 = vector.load %arg7[%c0_20, %c0_21] : memref<1x128xf32, #tpu.memory_space<vmem>>, vector<1x128xf32>
      %30 = vector.broadcast %29 : vector<1x128xf32> to vector<16x128xf32>
      %31 = arith.addf %28, %30 : vector<16x128xf32>
      %cst_22 = arith.constant 0.000000e+00 : f32
      %32 = vector.broadcast %cst_22 : f32 to vector<16x128xf32>
      %33 = arith.maximumf %31, %32 : vector<16x128xf32>
      %34 = arith.truncf %33 : vector<16x128xf32> to vector<16x128xbf16>
      %c0_23 = arith.constant 0 : index
      %c0_24 = arith.constant 0 : index
      %35 = vector.load %arg8[%c0_23, %c0_24] : memref<16x128xbf16, #tpu.memory_space<vmem>>, vector<16x128xbf16>
      tpu.vector_store %arg8[%c0_23, %c0_24], %34 {strides = array<i32>} : memref<16x128xbf16, #tpu.memory_space<vmem>>, vector<16x128xbf16>,
    } else {
    }
    return
  }
  func.func @transform_0(%arg0: i32, %arg1: i32) -> (i32, i32) {
    %c0_i32 = arith.constant 0 : i32
    %c0_i32_0 = arith.constant 0 : i32
    return %c0_i32, %arg1 : i32, i32
  }
  func.func @transform_1(%arg0: i32, %arg1: i32) -> (i32, i32) {
    %c0_i32 = arith.constant 0 : i32
    %c0_i32_0 = arith.constant 0 : i32
    return %arg1, %c0_i32 : i32, i32
  }
  func.func @transform_2(%arg0: i32, %arg1: i32) -> (i32, i32) {
    %c0_i32 = arith.constant 0 : i32
    %c0_i32_0 = arith.constant 0 : i32
    return %arg0, %c0_i32 : i32, i32
  }
  func.func @transform_3(%arg0: i32, %arg1: i32) -> (i32, i32) {
    %c0_i32 = arith.constant 0 : i32
    %c0_i32_0 = arith.constant 0 : i32
    %c0_i32_1 = arith.constant 0 : i32
    return %c0_i32, %c0_i32_0 : i32, i32
  }
  func.func @transform_4(%arg0: i32, %arg1: i32) -> (i32, i32) {
    %c0_i32 = arith.constant 0 : i32
    %c0_i32_0 = arith.constant 0 : i32
    %c0_i32_1 = arith.constant 0 : i32
    return %c0_i32, %c0_i32_0 : i32, i32
  }
  func.func @transform_5(%arg0: i32, %arg1: i32) -> (i32, i32) {
    %c0_i32 = arith.constant 0 : i32
    %c0_i32_0 = arith.constant 0 : i32
    %c0_i32_1 = arith.constant 0 : i32
    return %c0_i32, %c0_i32_0 : i32, i32
  }
  func.func @transform_6(%arg0: i32, %arg1: i32) -> (i32, i32) {
    %c0_i32 = arith.constant 0 : i32
    %c0_i32_0 = arith.constant 0 : i32
    return %arg0, %c0_i32 : i32, i32
  }
}

module attributes {stable_mosaic.version = 11 : i64} {
  func.func @_scatter_update_kernel(%arg0: i32, %arg1: i32, %arg2: memref<1x32xi32, #tpu.memory_space<vmem>>, %arg3: memref<32x128xbf16, #tpu.memory_space<vmem>>, %arg4: memref<16x128xbf16, #tpu.memory_space<vmem>>, %arg5: memref<128x128xbf16, #tpu.memory_space<vmem>>, %arg6: memref<128x128xbf16, #tpu.memory_space<vmem>>, %arg7: memref<1x128xf32, #tpu.memory_space<vmem>>, %arg8: memref<16x128xf32, #tpu.memory_space<vmem>>, %arg9: memref<16x128xf32, #tpu.memory_space<vmem>>) attributes {dimension_semantics = [#tpu.dimension_semantics<parallel>, #tpu.dimension_semantics<arbitrary>], iteration_bounds = array<i64: 1, 1>, scalar_prefetch = 0 : i64, scratch_operands = 1 : i64, tpu.core_type = #tpu.core_type<tc>, window_params = [{transform_indices = @transform_0, window_bounds = array<i64: 1, 32>}, {transform_indices = @transform_1, window_bounds = array<i64: 32, 128>}, {transform_indices = @transform_2, window_bounds = array<i64: 16, 128>}, {pipeline_mode = #tpu.pipeline_mode<synchronous>, transform_indices = @transform_3, window_bounds = array<i64: 128, 128>}, {pipeline_mode = #tpu.pipeline_mode<synchronous>, transform_indices = @transform_4, window_bounds = array<i64: 128, 128>}, {pipeline_mode = #tpu.pipeline_mode<synchronous>, transform_indices = @transform_5, window_bounds = array<i64: 1, 128>}, {transform_indices = @transform_6, window_bounds = array<i64: 16, 128>}]} {
    %c0_i32 = arith.constant 0 : i32
    %0 = arith.cmpi eq, %arg1, %c0_i32 : i32
    %1 = arith.extui %0 : i1 to i32
    %c0_i32_0 = arith.constant 0 : i32
    %2 = arith.cmpi ne, %1, %c0_i32_0 : i32
    scf.if %2 {
      %cst_10 = arith.constant 0.000000e+00 : f32
      %21 = vector.broadcast %cst_10 : f32 to vector<16x128xf32>
      %c0_11 = arith.constant 0 : index
      %c0_12 = arith.constant 0 : index
      %22 = vector.load %arg9[%c0_11, %c0_12] : memref<16x128xf32, #tpu.memory_space<vmem>>, vector<16x128xf32>
      tpu.vector_store %arg9[%c0_11, %c0_12], %21 {strides = array<i32>} : memref<16x128xf32, #tpu.memory_space<vmem>>, vector<16x128xf32>,
    } else {
    }
    %c0 = arith.constant 0 : index
    %c0_1 = arith.constant 0 : index
    %3 = vector.load %arg2[%c0, %c0_1] : memref<1x32xi32, #tpu.memory_space<vmem>>, vector<1x32xi32>
    %c16_i32 = arith.constant 16 : i32
    %4 = arith.muli %arg0, %c16_i32 : i32
    %5 = vector.broadcast %4 : i32 to vector<1x32xi32>
    %6 = arith.subi %3, %5 : vector<1x32xi32>
    %7 = tpu.iota {dimensions = array<i32: 0>} : vector<16x32xi32>
    %8 = vector.broadcast %6 : vector<1x32xi32> to vector<16x32xi32>
    %9 = arith.cmpi eq, %7, %8 : vector<16x32xi32>
    %10 = arith.extui %9 : vector<16x32xi1> to vector<16x32xi32>
    %11 = arith.sitofp %10 : vector<16x32xi32> to vector<16x32xf32>
    %12 = arith.truncf %11 : vector<16x32xf32> to vector<16x32xbf16>
    %c0_2 = arith.constant 0 : index
    %c0_3 = arith.constant 0 : index
    %13 = vector.load %arg9[%c0_2, %c0_3] : memref<16x128xf32, #tpu.memory_space<vmem>>, vector<16x128xf32>
    %c0_4 = arith.constant 0 : index
    %c0_5 = arith.constant 0 : index
    %14 = vector.load %arg3[%c0_4, %c0_5] : memref<32x128xbf16, #tpu.memory_space<vmem>>, vector<32x128xbf16>
    %cst = arith.constant dense<0.000000e+00> : vector<16x128xf32>
    %15 = tpu.matmul %12, %14, %cst {dimension_numbers = #tpu.dot_dimension_numbers<[1], [0], [0], [1], [0, 0, 1, 1], [], []>} : vector<16x32xbf16>, vector<32x128xbf16>, vector<16x128xf32> -> vector<16x128xf32>
    %16 = arith.addf %13, %15 : vector<16x128xf32>
    %c0_6 = arith.constant 0 : index
    %c0_7 = arith.constant 0 : index
    %17 = vector.load %arg9[%c0_6, %c0_7] : memref<16x128xf32, #tpu.memory_space<vmem>>, vector<16x128xf32>
    tpu.vector_store %arg9[%c0_6, %c0_7], %16 {strides = array<i32>} : memref<16x128xf32, #tpu.memory_space<vmem>>, vector<16x128xf32>,
    %c0_i32_8 = arith.constant 0 : i32
    %18 = arith.cmpi eq, %arg1, %c0_i32_8 : i32
    %19 = arith.extui %18 : i1 to i32
    %c0_i32_9 = arith.constant 0 : i32
    %20 = arith.cmpi ne, %19, %c0_i32_9 : i32
    scf.if %20 {
      %c0_10 = arith.constant 0 : index
      %c0_11 = arith.constant 0 : index
      %21 = vector.load %arg4[%c0_10, %c0_11] : memref<16x128xbf16, #tpu.memory_space<vmem>>, vector<16x128xbf16>
      %c0_12 = arith.constant 0 : index
      %c0_13 = arith.constant 0 : index
      %22 = vector.load %arg5[%c0_12, %c0_13] : memref<128x128xbf16, #tpu.memory_space<vmem>>, vector<128x128xbf16>
      %cst_14 = arith.constant dense<0.000000e+00> : vector<16x128xf32>
      %23 = tpu.matmul %21, %22, %cst_14 {dimension_numbers = #tpu.dot_dimension_numbers<[1], [0], [0], [1], [0, 0, 1, 1], [], []>} : vector<16x128xbf16>, vector<128x128xbf16>, vector<16x128xf32> -> vector<16x128xf32>
      %c0_15 = arith.constant 0 : index
      %c0_16 = arith.constant 0 : index
      %24 = vector.load %arg9[%c0_15, %c0_16] : memref<16x128xf32, #tpu.memory_space<vmem>>, vector<16x128xf32>
      %25 = arith.truncf %24 : vector<16x128xf32> to vector<16x128xbf16>
      %c0_17 = arith.constant 0 : index
      %c0_18 = arith.constant 0 : index
      %26 = vector.load %arg6[%c0_17, %c0_18] : memref<128x128xbf16, #tpu.memory_space<vmem>>, vector<128x128xbf16>
      %cst_19 = arith.constant dense<0.000000e+00> : vector<16x128xf32>
      %27 = tpu.matmul %25, %26, %cst_19 {dimension_numbers = #tpu.dot_dimension_numbers<[1], [0], [0], [1], [0, 0, 1, 1], [], []>} : vector<16x128xbf16>, vector<128x128xbf16>, vector<16x128xf32> -> vector<16x128xf32>
      %28 = arith.addf %23, %27 : vector<16x128xf32>
      %c0_20 = arith.constant 0 : index
      %c0_21 = arith.constant 0 : index
      %29 = vector.load %arg7[%c0_20, %c0_21] : memref<1x128xf32, #tpu.memory_space<vmem>>, vector<1x128xf32>
      %30 = vector.broadcast %29 : vector<1x128xf32> to vector<16x128xf32>
      %31 = arith.addf %28, %30 : vector<16x128xf32>
      %cst_22 = arith.constant 0.000000e+00 : f32
      %32 = vector.broadcast %cst_22 : f32 to vector<16x128xf32>
      %33 = arith.maximumf %31, %32 : vector<16x128xf32>
      %c0_23 = arith.constant 0 : index
      %c0_24 = arith.constant 0 : index
      %34 = vector.load %arg8[%c0_23, %c0_24] : memref<16x128xf32, #tpu.memory_space<vmem>>, vector<16x128xf32>
      tpu.vector_store %arg8[%c0_23, %c0_24], %33 {strides = array<i32>} : memref<16x128xf32, #tpu.memory_space<vmem>>, vector<16x128xf32>,
    } else {
    }
    return
  }
  func.func @transform_0(%arg0: i32, %arg1: i32) -> (i32, i32) {
    %c0_i32 = arith.constant 0 : i32
    %c0_i32_0 = arith.constant 0 : i32
    return %c0_i32, %arg1 : i32, i32
  }
  func.func @transform_1(%arg0: i32, %arg1: i32) -> (i32, i32) {
    %c0_i32 = arith.constant 0 : i32
    %c0_i32_0 = arith.constant 0 : i32
    return %arg1, %c0_i32 : i32, i32
  }
  func.func @transform_2(%arg0: i32, %arg1: i32) -> (i32, i32) {
    %c0_i32 = arith.constant 0 : i32
    %c0_i32_0 = arith.constant 0 : i32
    return %arg0, %c0_i32 : i32, i32
  }
  func.func @transform_3(%arg0: i32, %arg1: i32) -> (i32, i32) {
    %c0_i32 = arith.constant 0 : i32
    %c0_i32_0 = arith.constant 0 : i32
    %c0_i32_1 = arith.constant 0 : i32
    return %c0_i32, %c0_i32_0 : i32, i32
  }
  func.func @transform_4(%arg0: i32, %arg1: i32) -> (i32, i32) {
    %c0_i32 = arith.constant 0 : i32
    %c0_i32_0 = arith.constant 0 : i32
    %c0_i32_1 = arith.constant 0 : i32
    return %c0_i32, %c0_i32_0 : i32, i32
  }
  func.func @transform_5(%arg0: i32, %arg1: i32) -> (i32, i32) {
    %c0_i32 = arith.constant 0 : i32
    %c0_i32_0 = arith.constant 0 : i32
    %c0_i32_1 = arith.constant 0 : i32
    return %c0_i32, %c0_i32_0 : i32, i32
  }
  func.func @transform_6(%arg0: i32, %arg1: i32) -> (i32, i32) {
    %c0_i32 = arith.constant 0 : i32
    %c0_i32_0 = arith.constant 0 : i32
    return %arg0, %c0_i32 : i32, i32
  }
}

</mosaic_0001>

<bundles_post_ra>
// kernel: gnn_forward.4
= control target key start
LH: loop header
LB: loop body
LE: loop exit
PB: predicated region body
PF: predicated region fallthrough
CT: control target
= control target key end

     0   :  { %s541_s3 = inlined_call_operand.vmem [shape: bf16[128,128], index: 3, kind: input, shape index: {}]   ;;  %s542_s2 = inlined_call_operand.vmem [shape: bf16[128,128], index: 2, kind: input, shape index: {}]   ;;  %s543_s1 = inlined_call_operand.vmem [shape: bf16[32,128], index: 1, kind: input, shape index: {}]   ;;  %s544_s0 = inlined_call_operand.vmem [shape: bf16[32,128], index: 0, kind: input, shape index: {}]   ;;  %s545_s4 = inlined_call_operand.vmem [shape: f32[1,128], index: 4, kind: input, shape index: {}]   ;;  %s546_s5 = inlined_call_operand.vmem [shape: bf16[32,128], index: 5, kind: output, shape index: {}]  }
   0x1   :  { %v422_v0 = vld [vmem:[%s541_s3] sm:$0xff]   ;;  %v424_v2 = vld [vmem:[%s541_s3 + $0x8] sm:$0xff]   ;;  %v426_v4 = vld [vmem:[%s541_s3 + $0x10] sm:$0xff]  }
   0x2   :  { %v423_v1 = vld [vmem:[%s542_s2] sm:$0xff]   ;;  %378 = vmatprep.subr.bf16.mxu1 %v422_v0  ;;  %v425_v3 = vld [vmem:[%s542_s2 + $0x8] sm:$0xff]   ;;  %v427_v5 = vld [vmem:[%s542_s2 + $0x10] sm:$0xff]  }
   0x3   :  { %398 = vmatprep.subr.bf16.mxu0 %v423_v1  ;;  %379 = vmatpush3.bf16.msra.mxu1 %v422_v0  ;;  %v428_v6 = vld [vmem:[%s541_s3 + $0x18] sm:$0xff]   ;;  %v430_v8 = vld [vmem:[%s541_s3 + $0x20] sm:$0xff]   ;;  %v432_v10 = vld [vmem:[%s541_s3 + $0x28] sm:$0xff]  }
   0x4   :  { %399 = vmatpush3.bf16.msra.mxu0 %v423_v1  ;;  %380 = vmatprep.subr.bf16.mxu1 %v424_v2  ;;  %v429_v7 = vld [vmem:[%s542_s2 + $0x18] sm:$0xff]   ;;  %v431_v9 = vld [vmem:[%s542_s2 + $0x20] sm:$0xff]   ;;  %v433_v11 = vld [vmem:[%s542_s2 + $0x28] sm:$0xff]  }
   0x5   :  { %400 = vmatprep.subr.bf16.mxu0 %v425_v3  ;;  %v438_v12 = vld [vmem:[%s543_s1] sm:$0xff]   ;;  %v434_v14 = vld [vmem:[%s541_s3 + $0x30] sm:$0xff]   ;;  %v436_v16 = vld [vmem:[%s541_s3 + $0x38] sm:$0xff]  }
   0x6   :  { %v439_v13 = vld [vmem:[%s544_s0] sm:$0xff]   ;;  %394 = vmatprep.mubr.bf16.mxu1 %v438_v12  ;;  %v435_v15 = vld [vmem:[%s542_s2 + $0x30] sm:$0xff]   ;;  %v437_v17 = vld [vmem:[%s542_s2 + $0x38] sm:$0xff]  }
   0x7   :  { %381 = vmatpush3.bf16.msra.mxu1 %v424_v2  ;;  %414 = vmatprep.mubr.bf16.mxu0 %v439_v13  ;;  %v440_v18 = vld [vmem:[%s543_s1 + $0x8] sm:$0xff]   ;;  %v338_v22 = vld [vmem:[%s545_s4] ss:$0 sm:$0xff] }
   0x8   :  { %401 = vmatpush3.bf16.msra.mxu0 %v425_v3  ;;  %382 = vmatprep.subr.bf16.mxu1 %v426_v4  ;;  %v441_v19 = vld [vmem:[%s544_s0 + $0x8] sm:$0xff]  }
   0x9   :  { %402 = vmatprep.subr.bf16.mxu0 %v427_v5 }
   0xb   :  { %383 = vmatpush3.bf16.msra.mxu1 %v426_v4 }
   0xc   :  { %403 = vmatpush3.bf16.msra.mxu0 %v427_v5  ;;  %384 = vmatprep.subr.bf16.mxu1 %v428_v6 }
   0xd   :  { %404 = vmatprep.subr.bf16.mxu0 %v429_v7 }
   0xf   :  { %385 = vmatpush3.bf16.msra.mxu1 %v428_v6 }
  0x10   :  { %405 = vmatpush3.bf16.msra.mxu0 %v429_v7  ;;  %386 = vmatprep.subr.bf16.mxu1 %v430_v8 }
  0x11   :  { %406 = vmatprep.subr.bf16.mxu0 %v431_v9 }
  0x13   :  { %387 = vmatpush3.bf16.msra.mxu1 %v430_v8 }
  0x14   :  { %407 = vmatpush3.bf16.msra.mxu0 %v431_v9  ;;  %388 = vmatprep.subr.bf16.mxu1 %v432_v10 }
  0x15   :  { %408 = vmatprep.subr.bf16.mxu0 %v433_v11 }
  0x17   :  { %389 = vmatpush3.bf16.msra.mxu1 %v432_v10 }
  0x18   :  { %409 = vmatpush3.bf16.msra.mxu0 %v433_v11  ;;  %390 = vmatprep.subr.bf16.mxu1 %v434_v14 }
  0x19   :  { %410 = vmatprep.subr.bf16.mxu0 %v435_v15 }
  0x1b   :  { %391 = vmatpush3.bf16.msra.mxu1 %v434_v14 }
  0x1c   :  { %411 = vmatpush3.bf16.msra.mxu0 %v435_v15  ;;  %392 = vmatprep.subr.bf16.mxu1 %v436_v16 }
  0x1d   :  { %412 = vmatprep.subr.bf16.mxu0 %v437_v17 }
  0x1f   :  { %393 = vmatpush3.bf16.msra.mxu1 %v436_v16 }
  0x20   :  { %413 = vmatpush3.bf16.msra.mxu0 %v437_v17 }
  0x22   :  { %395 = vmatmul.mubr.bf16.vlgmr.msra.gmra.mrb[0].mxu1 %v440_v18 }
  0x23   :  { %415 = vmatmul.mubr.bf16.vlgmr.msra.gmra.mrb[0].mxu0 %v441_v19 }
  0xf5   :  { %v396_v20 = vpop.f32.mrb[0].mxu1 }
  0xf6   :  { %v416_v21 = vpop.f32.mrb[0].mxu0  ;;  %v155_v23 = vpop.f32.mrb[1].mxu1 }
  0xf7   :  { %v273_v24 = vadd.f32 %v416_v21, %v396_v20  ;;  %v264_v25 = vpop.f32.mrb[1].mxu0  ;;  %v397_v26 = vpop.f32.mrb[2].mxu1 }
  0xf8   :  { %v265_v27 = vadd.f32 %v264_v25, %v155_v23  ;;  %v417_v28 = vpop.f32.mrb[2].mxu0  ;;  %v158_v29 = vpop.f32.mrb[3].mxu1 }
  0xf9   :  { %v288_v30 = vadd.f32 %v338_v22, %v273_v24  ;;  %v276_v31 = vadd.f32 %v417_v28, %v397_v26  ;;  %v267_v32 = vpop.f32.mrb[3].mxu0 }
  0xfa   :  { %v286_v33 = vadd.f32 %v338_v22, %v265_v27  ;;  %v268_v34 = vadd.f32 %v267_v32, %v158_v29 }
  0xfb   :  { %v289_v35 = vadd.f32 %v338_v22, %v276_v31  ;;  %v292_v37 = vmax.f32 %v288_v30, 0.0 }
  0xfc   :  { %v287_v36 = vadd.f32 %v338_v22, %v268_v34  ;;  %v290_v39 = vmax.f32 %v286_v33, 0.0 }
  0xfd   :  { %v293_v38 = vmax.f32 %v289_v35, 0.0 }
  0xfe   :  { %v291_v40 = vmax.f32 %v287_v36, 0.0 }
  0xff   :  { %v355_v41 = vpack.c.bf16 %v293_v38, %v292_v37 }
 0x100   :  { %v350_v42 = vpack.c.bf16 %v291_v40, %v290_v39 }
 0x101   :  { %357 = vst [vmem:[%s546_s5 + $0x8] sm:$0xff] %v355_v41  }
 0x102   :  { %351 = vst [vmem:[%s546_s5] sm:$0xff] %v350_v42  }

// kernel: gnn_forward.5
= control target key start
LH: loop header
LB: loop body
LE: loop exit
PB: predicated region body
PF: predicated region fallthrough
CT: control target
= control target key end

     0   :  { %v34_v0 = vlaneseq  ;;  %v487_v1 = vmov 0.0   ;;  %vm488_vm0 = vmmov 0   ;;  %vm66_vm3 = vcmask 261120   ;;  %s616_s1 = inlined_call_operand.vmem [shape: bf16[32,128], index: 1, kind: input, shape index: {}]   ;;  %s617_s0 = inlined_call_operand.vmem [shape: s32[1,32], index: 0, kind: input, shape index: {}]   ;;  %s618_s3 = inlined_call_operand.vmem [shape: bf16[128,128], index: 3, kind: input, shape index: {}]   ;;  %s619_s4 = inlined_call_operand.vmem [shape: bf16[128,128], index: 4, kind: input, shape index: {}]   ;;  %s620_s2 = inlined_call_operand.vmem [shape: bf16[16,128], index: 2, kind: input, shape index: {}]   ;;  %s621_s5 = inlined_call_operand.vmem [shape: f32[1,128], index: 5, kind: input, shape index: {}]   ;;  %s622_s6 = inlined_call_operand.vmem [shape: bf16[16,128], index: 6, kind: output, shape index: {}]  }
   0x1   :  { %418 = vmatprep.subr.bf16.mxu0 %v487_v1  ;;  %v468_v2 = vld [vmem:[%s616_s1] sm:$0xff]   ;;  %422 = vmatprep.mubr.msk.bf16.mxu0 %vm488_vm0, %v487_v1  ;;  %v469_v3 = vld [vmem:[%s616_s1 + $0x8] sm:$0xff]   ;;  %v475_v14 = vld [vmem:[%s619_s4 + $0x10] sm:$0xff]  }
   0x2   :  { %v35_v4 = vshrl.u32 %v34_v0, 7  ;;  %426 = vmatprep.subr.bf16.mxu1 %v487_v1  ;;  %442 = vmatprep.mubr.msk.bf16.mxu1 %vm488_vm0, %v487_v1  ;;  %v364_v5 = vld [vmem:[%s617_s0] ss:$0 sm:$0xff]  ;;  %v473_v11 = vld [vmem:[%s619_s4 + $0x8] sm:$0xff]   ;;  %v474_v15 = vld [vmem:[%s618_s3 + $0x10] sm:$0xff]  }
   0x3   :  { %419 = vmatpush3.bf16.msra.mxu0 %v468_v2  ;;  %v471_v8 = vld [vmem:[%s619_s4] sm:$0xff]   ;;  %v472_v13 = vld [vmem:[%s618_s3 + $0x8] sm:$0xff]   ;;  %v477_v16 = vld [vmem:[%s619_s4 + $0x18] sm:$0xff]  }
   0x4   :  { %420 = vmatprep.subr.bf16.mxu0 %v487_v1  ;;  %v36_v6 = vadd.s32 8, %v35_v4  ;;  %vm41_vm1 = vcmp.eq.s32.totalorder %v35_v4, %v364_v5  ;;  %v470_v9 = vld [vmem:[%s618_s3] sm:$0xff]   ;;  %427 = vmatpush3.bf16.msra.mxu1 %v471_v8  ;;  %v476_v17 = vld [vmem:[%s618_s3 + $0x18] sm:$0xff]   ;;  %v481_v20 = vld [vmem:[%s619_s4 + $0x28] sm:$0xff]  }
   0x5   :  { %v365_v7 = vsel %vm41_vm1, 1.0, %v487_v1  ;;  %428 = vmatprep.subr.bf16.mxu1 %v487_v1  ;;  %v479_v18 = vld [vmem:[%s619_s4 + $0x20] sm:$0xff]   ;;  %v480_v21 = vld [vmem:[%s618_s3 + $0x28] sm:$0xff]   ;;  %v483_v22 = vld [vmem:[%s619_s4 + $0x30] sm:$0xff]  }
   0x6   :  { %vm42_vm2 = vcmp.eq.s32.totalorder %v36_v6, %v364_v5  ;;  %v478_v19 = vld [vmem:[%s618_s3 + $0x20] sm:$0xff]   ;;  %v482_v23 = vld [vmem:[%s618_s3 + $0x30] sm:$0xff]   ;;  %v484_v24 = vld [vmem:[%s618_s3 + $0x38] sm:$0xff]  }
   0x7   :  { %421 = vmatpush3.bf16.msra.mxu0 %v469_v3  ;;  %v366_v10 = vsel %vm42_vm2, 1.0, %v487_v1  ;;  %v485_v25 = vld [vmem:[%s619_s4 + $0x38] sm:$0xff]   ;;  %v486_v26 = vld [vmem:[%s620_s2] sm:$0xff]  }
   0x8   :  { %v47_v12 = vpack.c.bf16 %v366_v10, %v365_v7  ;;  %446 = vmatprep.subr.bf16.mxu0 %v487_v1  ;;  %429 = vmatpush3.bf16.msra.mxu1 %v473_v11  ;;  %v387_v37 = vld [vmem:[%s621_s5] ss:$0 sm:$0xff] }
   0x9   :  { %430 = vmatprep.subr.bf16.mxu1 %v487_v1 }
   0xa   :  { %423 = vmatmul.mubr.msk.bf16.vlgmr.msra.gmra.mrb[0].mxu0 %vm66_vm3, %v47_v12 }
   0xb   :  { %447 = vmatpush3.bf16.msra.mxu0 %v470_v9  ;;  %462 = vmatprep.mubr.msk.bf16.mxu0 %vm488_vm0, %v487_v1 }
   0xc   :  { %448 = vmatprep.subr.bf16.mxu0 %v487_v1  ;;  %431 = vmatpush3.bf16.msra.mxu1 %v475_v14 }
   0xd   :  { %432 = vmatprep.subr.bf16.mxu1 %v487_v1 }
   0xf   :  { %449 = vmatpush3.bf16.msra.mxu0 %v472_v13 }
  0x10   :  { %450 = vmatprep.subr.bf16.mxu0 %v487_v1  ;;  %433 = vmatpush3.bf16.msra.mxu1 %v477_v16 }
  0x11   :  { %434 = vmatprep.subr.bf16.mxu1 %v487_v1 }
  0x13   :  { %451 = vmatpush3.bf16.msra.mxu0 %v474_v15 }
  0x14   :  { %452 = vmatprep.subr.bf16.mxu0 %v487_v1  ;;  %435 = vmatpush3.bf16.msra.mxu1 %v479_v18 }
  0x15   :  { %436 = vmatprep.subr.bf16.mxu1 %v487_v1 }
  0x17   :  { %453 = vmatpush3.bf16.msra.mxu0 %v476_v17 }
  0x18   :  { %454 = vmatprep.subr.bf16.mxu0 %v487_v1  ;;  %437 = vmatpush3.bf16.msra.mxu1 %v481_v20 }
  0x19   :  { %438 = vmatprep.subr.bf16.mxu1 %v487_v1 }
  0x1b   :  { %455 = vmatpush3.bf16.msra.mxu0 %v478_v19 }
  0x1c   :  { %456 = vmatprep.subr.bf16.mxu0 %v487_v1  ;;  %439 = vmatpush3.bf16.msra.mxu1 %v483_v22 }
  0x1d   :  { %440 = vmatprep.subr.bf16.mxu1 %v487_v1 }
  0x1f   :  { %457 = vmatpush3.bf16.msra.mxu0 %v480_v21 }
  0x20   :  { %458 = vmatprep.subr.bf16.mxu0 %v487_v1  ;;  %441 = vmatpush3.bf16.msra.mxu1 %v485_v25 }
  0x23   :  { %459 = vmatpush3.bf16.msra.mxu0 %v482_v23 }
  0x24   :  { %460 = vmatprep.subr.bf16.mxu0 %v487_v1 }
  0x27   :  { %461 = vmatpush3.bf16.msra.mxu0 %v484_v24 }
  0x2a   :  { %463 = vmatmul.mubr.bf16.vlgmr.msra.gmra.mrb[4].mxu0 %v486_v26 }
  0xdd   :  { %v104_v27 = vpop.f32.mrb[0].mxu0 }
  0xde   :  { %v424_v28 = vpop.f32.mrb[1].mxu0 }
  0xdf   :  { %v107_v29 = vpop.f32.mrb[2].mxu0 }
  0xe0   :  { %v138_v30 = vpack.c.bf16 %v107_v29, %v104_v27  ;;  %v425_v31 = vpop.f32.mrb[3].mxu0 }
  0xe2   :  { %443 = vmatmul.mubr.bf16.vlgmr.msra.gmra.mrb[0].mxu1 %v138_v30 }
  0xfd   :  { %v332_v32 = vpop.f32.mrb[4].mxu0 }
  0xfe   :  { %v464_v33 = vpop.f32.mrb[5].mxu0 }
  0xff   :  { %v335_v34 = vpop.f32.mrb[6].mxu0 }
 0x100   :  { %v465_v35 = vpop.f32.mrb[7].mxu0 }
 0x1b5   :  { %v237_v36 = vpop.f32.mrb[0].mxu1 }
 0x1b6   :  { %v333_v38 = vadd.f32 %v332_v32, %v237_v36  ;;  %v444_v39 = vpop.f32.mrb[1].mxu1 }
 0x1b7   :  { %v240_v40 = vpop.f32.mrb[2].mxu1 }
 0x1b8   :  { %v346_v41 = vadd.f32 %v387_v37, %v333_v38  ;;  %v336_v42 = vadd.f32 %v335_v34, %v240_v40  ;;  %v445_v43 = vpop.f32.mrb[3].mxu1 }
 0x1ba   :  { %v347_v44 = vadd.f32 %v387_v37, %v336_v42  ;;  %v348_v45 = vmax.f32 %v346_v41, 0.0 }
 0x1bc   :  { %v349_v46 = vmax.f32 %v347_v44, 0.0 }
 0x1be   :  { %v395_v47 = vpack.c.bf16 %v349_v46, %v348_v45 }
 0x1c0   :  { %396 = vst [vmem:[%s622_s6] sm:$0xff] %v395_v47  }

// kernel: gnn_forward.7
= control target key start
LH: loop header
LB: loop body
LE: loop exit
PB: predicated region body
PF: predicated region fallthrough
CT: control target
= control target key end

     0   :  { %v34_v0 = vlaneseq  ;;  %v470_v1 = vmov 0.0   ;;  %vm471_vm0 = vmmov 0   ;;  %vm66_vm3 = vcmask 261120   ;;  %s602_s1 = inlined_call_operand.vmem [shape: bf16[32,128], index: 1, kind: input, shape index: {}]   ;;  %s603_s0 = inlined_call_operand.vmem [shape: s32[1,32], index: 0, kind: input, shape index: {}]   ;;  %s604_s3 = inlined_call_operand.vmem [shape: bf16[128,128], index: 3, kind: input, shape index: {}]   ;;  %s605_s4 = inlined_call_operand.vmem [shape: bf16[128,128], index: 4, kind: input, shape index: {}]   ;;  %s606_s2 = inlined_call_operand.vmem [shape: bf16[16,128], index: 2, kind: input, shape index: {}]   ;;  %s607_s5 = inlined_call_operand.vmem [shape: f32[1,128], index: 5, kind: input, shape index: {}]   ;;  %s608_s6 = inlined_call_operand.vmem [shape: f32[16,128], index: 6, kind: output, shape index: {}]  }
   0x1   :  { %401 = vmatprep.subr.bf16.mxu0 %v470_v1  ;;  %v451_v2 = vld [vmem:[%s602_s1] sm:$0xff]   ;;  %405 = vmatprep.mubr.msk.bf16.mxu0 %vm471_vm0, %v470_v1  ;;  %v452_v3 = vld [vmem:[%s602_s1 + $0x8] sm:$0xff]   ;;  %v458_v14 = vld [vmem:[%s605_s4 + $0x10] sm:$0xff]  }
   0x2   :  { %v35_v4 = vshrl.u32 %v34_v0, 7  ;;  %409 = vmatprep.subr.bf16.mxu1 %v470_v1  ;;  %425 = vmatprep.mubr.msk.bf16.mxu1 %vm471_vm0, %v470_v1  ;;  %v356_v5 = vld [vmem:[%s603_s0] ss:$0 sm:$0xff]  ;;  %v456_v11 = vld [vmem:[%s605_s4 + $0x8] sm:$0xff]   ;;  %v457_v15 = vld [vmem:[%s604_s3 + $0x10] sm:$0xff]  }
   0x3   :  { %402 = vmatpush3.bf16.msra.mxu0 %v451_v2  ;;  %v454_v8 = vld [vmem:[%s605_s4] sm:$0xff]   ;;  %v455_v13 = vld [vmem:[%s604_s3 + $0x8] sm:$0xff]   ;;  %v460_v16 = vld [vmem:[%s605_s4 + $0x18] sm:$0xff]  }
   0x4   :  { %403 = vmatprep.subr.bf16.mxu0 %v470_v1  ;;  %v36_v6 = vadd.s32 8, %v35_v4  ;;  %vm41_vm1 = vcmp.eq.s32.totalorder %v35_v4, %v356_v5  ;;  %v453_v9 = vld [vmem:[%s604_s3] sm:$0xff]   ;;  %410 = vmatpush3.bf16.msra.mxu1 %v454_v8  ;;  %v459_v17 = vld [vmem:[%s604_s3 + $0x18] sm:$0xff]   ;;  %v464_v20 = vld [vmem:[%s605_s4 + $0x28] sm:$0xff]  }
   0x5   :  { %v357_v7 = vsel %vm41_vm1, 1.0, %v470_v1  ;;  %411 = vmatprep.subr.bf16.mxu1 %v470_v1  ;;  %v462_v18 = vld [vmem:[%s605_s4 + $0x20] sm:$0xff]   ;;  %v463_v21 = vld [vmem:[%s604_s3 + $0x28] sm:$0xff]   ;;  %v466_v22 = vld [vmem:[%s605_s4 + $0x30] sm:$0xff]  }
   0x6   :  { %vm42_vm2 = vcmp.eq.s32.totalorder %v36_v6, %v356_v5  ;;  %v461_v19 = vld [vmem:[%s604_s3 + $0x20] sm:$0xff]   ;;  %v465_v23 = vld [vmem:[%s604_s3 + $0x30] sm:$0xff]   ;;  %v467_v24 = vld [vmem:[%s604_s3 + $0x38] sm:$0xff]  }
   0x7   :  { %404 = vmatpush3.bf16.msra.mxu0 %v452_v3  ;;  %v358_v10 = vsel %vm42_vm2, 1.0, %v470_v1  ;;  %v468_v25 = vld [vmem:[%s605_s4 + $0x38] sm:$0xff]   ;;  %v469_v26 = vld [vmem:[%s606_s2] sm:$0xff]  }
   0x8   :  { %v47_v12 = vpack.c.bf16 %v358_v10, %v357_v7  ;;  %429 = vmatprep.subr.bf16.mxu0 %v470_v1  ;;  %412 = vmatpush3.bf16.msra.mxu1 %v456_v11  ;;  %v379_v37 = vld [vmem:[%s607_s5] ss:$0 sm:$0xff] }
   0x9   :  { %413 = vmatprep.subr.bf16.mxu1 %v470_v1 }
   0xa   :  { %406 = vmatmul.mubr.msk.bf16.vlgmr.msra.gmra.mrb[0].mxu0 %vm66_vm3, %v47_v12 }
   0xb   :  { %430 = vmatpush3.bf16.msra.mxu0 %v453_v9  ;;  %445 = vmatprep.mubr.msk.bf16.mxu0 %vm471_vm0, %v470_v1 }
   0xc   :  { %431 = vmatprep.subr.bf16.mxu0 %v470_v1  ;;  %414 = vmatpush3.bf16.msra.mxu1 %v458_v14 }
   0xd   :  { %415 = vmatprep.subr.bf16.mxu1 %v470_v1 }
   0xf   :  { %432 = vmatpush3.bf16.msra.mxu0 %v455_v13 }
  0x10   :  { %433 = vmatprep.subr.bf16.mxu0 %v470_v1  ;;  %416 = vmatpush3.bf16.msra.mxu1 %v460_v16 }
  0x11   :  { %417 = vmatprep.subr.bf16.mxu1 %v470_v1 }
  0x13   :  { %434 = vmatpush3.bf16.msra.mxu0 %v457_v15 }
  0x14   :  { %435 = vmatprep.subr.bf16.mxu0 %v470_v1  ;;  %418 = vmatpush3.bf16.msra.mxu1 %v462_v18 }
  0x15   :  { %419 = vmatprep.subr.bf16.mxu1 %v470_v1 }
  0x17   :  { %436 = vmatpush3.bf16.msra.mxu0 %v459_v17 }
  0x18   :  { %437 = vmatprep.subr.bf16.mxu0 %v470_v1  ;;  %420 = vmatpush3.bf16.msra.mxu1 %v464_v20 }
  0x19   :  { %421 = vmatprep.subr.bf16.mxu1 %v470_v1 }
  0x1b   :  { %438 = vmatpush3.bf16.msra.mxu0 %v461_v19 }
  0x1c   :  { %439 = vmatprep.subr.bf16.mxu0 %v470_v1  ;;  %422 = vmatpush3.bf16.msra.mxu1 %v466_v22 }
  0x1d   :  { %423 = vmatprep.subr.bf16.mxu1 %v470_v1 }
  0x1f   :  { %440 = vmatpush3.bf16.msra.mxu0 %v463_v21 }
  0x20   :  { %441 = vmatprep.subr.bf16.mxu0 %v470_v1  ;;  %424 = vmatpush3.bf16.msra.mxu1 %v468_v25 }
  0x23   :  { %442 = vmatpush3.bf16.msra.mxu0 %v465_v23 }
  0x24   :  { %443 = vmatprep.subr.bf16.mxu0 %v470_v1 }
  0x27   :  { %444 = vmatpush3.bf16.msra.mxu0 %v467_v24 }
  0x2a   :  { %446 = vmatmul.mubr.bf16.vlgmr.msra.gmra.mrb[4].mxu0 %v469_v26 }
  0xdd   :  { %v104_v27 = vpop.f32.mrb[0].mxu0 }
  0xde   :  { %v407_v28 = vpop.f32.mrb[1].mxu0 }
  0xdf   :  { %v107_v29 = vpop.f32.mrb[2].mxu0 }
  0xe0   :  { %v138_v30 = vpack.c.bf16 %v107_v29, %v104_v27  ;;  %v408_v31 = vpop.f32.mrb[3].mxu0 }
  0xe2   :  { %426 = vmatmul.mubr.bf16.vlgmr.msra.gmra.mrb[0].mxu1 %v138_v30 }
  0xfd   :  { %v332_v32 = vpop.f32.mrb[4].mxu0 }
  0xfe   :  { %v447_v33 = vpop.f32.mrb[5].mxu0 }
  0xff   :  { %v335_v34 = vpop.f32.mrb[6].mxu0 }
 0x100   :  { %v448_v35 = vpop.f32.mrb[7].mxu0 }
 0x1b5   :  { %v237_v36 = vpop.f32.mrb[0].mxu1 }
 0x1b6   :  { %v333_v38 = vadd.f32 %v332_v32, %v237_v36  ;;  %v427_v39 = vpop.f32.mrb[1].mxu1 }
 0x1b7   :  { %v240_v40 = vpop.f32.mrb[2].mxu1 }
 0x1b8   :  { %v346_v41 = vadd.f32 %v379_v37, %v333_v38  ;;  %v336_v42 = vadd.f32 %v335_v34, %v240_v40  ;;  %v428_v43 = vpop.f32.mrb[3].mxu1 }
 0x1ba   :  { %v348_v44 = vmax.f32 %v346_v41, 0.0  ;;  %v347_v45 = vadd.f32 %v379_v37, %v336_v42 }
 0x1bc   :  { %350 = vst [vmem:[%s608_s6] sm:$0xff] %v348_v44  ;;  %v349_v46 = vmax.f32 %v347_v45, 0.0 }
 0x1be   :  { %351 = vst [vmem:[%s608_s6 + $0x8] sm:$0xff] %v349_v46 }

</bundles_post_ra>
